<compile_context>
chip_gen: v7x
topology: tpu7x:2x2x1
jax: 0.10.0
libtpu: 0.0.40
codegen_flags: <defaults>
</compile_context>

<pallas_src>
import functools

import jax
import jax.numpy as jnp
import numpy as np
from jax import lax
from jax.experimental import pallas as pl
from jax.experimental.pallas import tpu as pltpu


def fire_kernel(x_ref, wsq_ref, bsq_ref, wexp_ref, bexp_ref, out_ref,
                sp_ref, pat_ref):
    # x_ref  : (Nb, H, W, Cin)          out_ref: (Nb, H, W, Ce1 + Ce3)
    # wsq_ref: (Cin, Csq)               bsq_ref: (1, Csq)      f32
    # wexp   : (9*Csq, Ce1 + Ce3)       bexp   : (1, Ce1+Ce3)  f32
    # sp_ref : (Nb, H+2, W+2, Csq) VMEM scratch (padded squeezed map)
    # pat_ref: (Nb*H*W, 9*Csq)     VMEM scratch (im2col patches)
    nb, H, W, Cin = x_ref.shape
    Csq = wsq_ref.shape[1]
    Cout = wexp_ref.shape[1]
    M = nb * H * W

    # --- squeeze 1x1 conv + bias + ReLU (f32 accumulate / elementwise) ---
    xf = x_ref[...].reshape(M, Cin).astype(wsq_ref.dtype)   # MXU operand dtype
    s = jnp.dot(xf, wsq_ref[...], preferred_element_type=jnp.float32)
    s = jnp.maximum(s + bsq_ref[...], 0.0)
    s = s.astype(sp_ref.dtype)

    # --- zero ONLY the four border strips of the padded scratch; the interior
    #     is fully overwritten below.  Done every grid step (cheap) so it is
    #     correct under megacore ("parallel") sharding where each TensorCore
    #     has its own scratch copy.
    zrow = jnp.zeros((nb, 1, W + 2, Csq), sp_ref.dtype)
    zcol = jnp.zeros((nb, H + 2, 1, Csq), sp_ref.dtype)
    sp_ref[:, 0:1, :, :] = zrow
    sp_ref[:, H + 1:H + 2, :, :] = zrow
    sp_ref[:, :, 0:1, :] = zcol
    sp_ref[:, :, W + 1:W + 2, :] = zcol
    sp_ref[:, 1:H + 1, 1:W + 1, :] = s.reshape(nb, H, W, Csq)

    # --- im2col: 9 direct tap-offset stores into the patches scratch
    #     (tap-major / channel-minor column order, matching the wexp layout).
    t = 0
    for ky in range(3):
        for kx in range(3):
            win = sp_ref[:, ky:ky + H, kx:kx + W, :]
            pat_ref[:, t * Csq:(t + 1) * Csq] = win.reshape(M, Csq)
            t += 1

    # --- fused expand (1x1 folded into the center tap) + bias + ReLU ---
    e = jnp.dot(pat_ref[...], wexp_ref[...], preferred_element_type=jnp.float32)
    e = jnp.maximum(e + bexp_ref[...], 0.0)

    # single full-width store of the concatenated [expand1x1, expand3x3] map
    out_ref[...] = e.reshape(nb, H, W, Cout).astype(out_ref.dtype)


def _ceil_to(x, m):
    return -(-x // m) * m


def _tile_bytes(shape, itemsize):
    """Rough VMEM footprint of a tile: last dim padded to 128 lanes,
    second-minor to 8 sublanes (conservative for packed sub-32-bit)."""
    lane = _ceil_to(shape[-1], 128)
    sub = _ceil_to(shape[-2], 8)
    lead = 1
    for d in shape[:-2]:
        lead *= d
    return lead * sub * lane * itemsize


def _vmem_estimate(nb, h, w, cin, csq, cout, xbytes, mmbytes):
    m = nb * h * w
    f32 = 4
    b = 0
    b += 2 * _tile_bytes((nb, h, w, cin), xbytes)          # input (double-buffered)
    b += 2 * _tile_bytes((nb, h, w, cout), xbytes)         # output (double-buffered)
    b += _tile_bytes((nb, h + 2, w + 2, csq), mmbytes)     # padded-squeeze scratch
    b += 2 * _tile_bytes((m, 9 * csq), mmbytes)            # patches scratch + live value
    b += _tile_bytes((m, cin), mmbytes)                    # x value
    b += 2 * _tile_bytes((m, csq), f32)                    # s (f32 + cast)
    b += _tile_bytes((m, cout), f32)                       # e accumulator
    b += 2 * (_tile_bytes((cin, csq), mmbytes)
              + _tile_bytes((9 * csq, cout), mmbytes))     # weights (double-buffered)
    return b


def _pick_batch_block(n, h, w, cin, csq, cout, xbytes, mmbytes,
                      budget_bytes=32 * 1024 * 1024, target_rows=512):
    """Images per grid step: feed the MXU ~512 M-rows, keep >=2 grid steps
    when possible, and stay under the VMEM budget."""
    def divisor_leq(k):
        k = max(1, min(n, k))
        while k > 1 and n % k:
            k -= 1
        return k

    nb = divisor_leq(-(-target_rows // (h * w)))
    if nb > 1 and n // nb < 2:          # leave work for the 2nd v7x TensorCore
        nb = divisor_leq(nb // 2)
    while nb > 1 and _vmem_estimate(nb, h, w, cin, csq, cout,
                                    xbytes, mmbytes) > budget_bytes:
        nb = divisor_leq(nb - 1)
    return nb


def fire_pallas_nhwc(x_nhwc, wsq, bsq, w1, b1, w3, b3, *, use_bf16_matmul=False):
    """Core kernel launcher; x_nhwc is (N, H, W, Cin) channels-last."""
    N, H, W, Cin = x_nhwc.shape
    Csq = wsq.shape[1]
    Ce1 = w1.shape[1]
    Ce3 = w3.shape[2]
    Cout = Ce1 + Ce3

    # MXU operand dtype: input dtype by default; optional bf16 fast path.
    mm_dtype = jnp.bfloat16 if use_bf16_matmul else x_nhwc.dtype

    # Fuse the two expand convs into one weight matrix:
    #   columns [0:Ce1] -> expand1x1 weights on the center-tap (t=4) rows
    #   columns [Ce1:]  -> expand3x3 weights, (9, Csq, Ce3) -> (9*Csq, Ce3)
    wexp = jnp.zeros((9, Csq, Cout), mm_dtype)
    wexp = wexp.at[4, :, :Ce1].set(w1.astype(mm_dtype))
    wexp = wexp.at[:, :, Ce1:].set(w3.astype(mm_dtype))
    wexp = wexp.reshape(9 * Csq, Cout)
    wsq_c = wsq.astype(mm_dtype)
    bsq_c = bsq.astype(jnp.float32)
    bexp = jnp.concatenate([b1, b3], axis=-1).astype(jnp.float32)   # (1, Cout)

    xbytes = jnp.dtype(x_nhwc.dtype).itemsize
    mmbytes = jnp.dtype(mm_dtype).itemsize
    nb = _pick_batch_block(N, H, W, Cin, Csq, Cout, xbytes, mmbytes)
    grid = (N // nb,)
    M = nb * H * W

    return pl.pallas_call(
        fire_kernel,
        out_shape=jax.ShapeDtypeStruct((N, H, W, Cout), x_nhwc.dtype),
        grid_spec=pltpu.PrefetchScalarGridSpec(
            num_scalar_prefetch=0,
            grid=grid,
            in_specs=[
                pl.BlockSpec((nb, H, W, Cin), lambda n: (n, 0, 0, 0)),
                pl.BlockSpec((Cin, Csq), lambda n: (0, 0)),
                pl.BlockSpec((1, Csq), lambda n: (0, 0)),
                pl.BlockSpec((9 * Csq, Cout), lambda n: (0, 0)),
                pl.BlockSpec((1, Cout), lambda n: (0, 0)),
            ],
            out_specs=pl.BlockSpec((nb, H, W, Cout), lambda n: (n, 0, 0, 0)),
            scratch_shapes=[
                pltpu.VMEM((nb, H + 2, W + 2, Csq), mm_dtype),   # padded squeeze map
                pltpu.VMEM((M, 9 * Csq), mm_dtype),              # im2col patches
            ],
        ),
        compiler_params=pltpu.CompilerParams(
            dimension_semantics=("parallel",),
            vmem_limit_bytes=48 * 1024 * 1024),
    )(x_nhwc, wsq_c, bsq_c, wexp, bexp)


@functools.partial(jax.jit, static_argnames=("use_bf16_matmul",))
def fire_pallas(x_nchw, wsq, bsq, w1, b1, w3, b3, use_bf16_matmul=False):
    # NCHW wrapper to match the PyTorch module interface.
    # NOTE: if the surrounding model is already channels-last, call
    # fire_pallas_nhwc directly and drop these two full-HBM transposes.
    x_nhwc = jnp.transpose(x_nchw, (0, 2, 3, 1))
    out_nhwc = fire_pallas_nhwc(x_nhwc, wsq, bsq, w1, b1, w3, b3,
                                use_bf16_matmul=use_bf16_matmul)
    return jnp.transpose(out_nhwc, (0, 3, 1, 2))


def fire_reference(x_nchw, wsq, bsq, w1, b1, w3, b3):
    """Pure-JAX reference using lax.conv, matching nn.Conv2d semantics."""
    Csq = wsq.shape[1]
    Ce1 = w1.shape[1]
    Ce3 = w3.shape[2]
    dn = ("NCHW", "OIHW", "NCHW")

    wsq_oihw = jnp.transpose(wsq, (1, 0))[:, :, None, None]      # (Csq, Cin, 1, 1)
    w1_oihw = jnp.transpose(w1, (1, 0))[:, :, None, None]        # (Ce1, Csq, 1, 1)
    w3_oihw = jnp.transpose(w3.reshape(3, 3, w3.shape[1], Ce3), (3, 2, 0, 1))

    s = lax.conv_general_dilated(x_nchw, wsq_oihw, (1, 1), "VALID",
                                 dimension_numbers=dn)
    s = jax.nn.relu(s + bsq.reshape(1, Csq, 1, 1))

    e1 = lax.conv_general_dilated(s, w1_oihw, (1, 1), "VALID",
                                  dimension_numbers=dn)
    e1 = jax.nn.relu(e1 + b1.reshape(1, Ce1, 1, 1))

    e3 = lax.conv_general_dilated(s, w3_oihw, (1, 1), ((1, 1), (1, 1)),
                                  dimension_numbers=dn)
    e3 = jax.nn.relu(e3 + b3.reshape(1, Ce3, 1, 1))

    return jnp.concatenate([e1, e3], axis=1)


if __name__ == "__main__":
    # Small Fire config: inplanes=8, squeeze=8, expand1x1=16, expand3x3=16
    N, Cin, H, W = 2, 8, 8, 8
    Csq, Ce1, Ce3 = 8, 16, 16

    key = jax.random.PRNGKey(0)
    ks = jax.random.split(key, 7)
    x = jax.random.normal(ks[0], (N, Cin, H, W), jnp.float32)

    # Deterministic synthetic parameters (kernel-friendly layouts):
    #   1x1 conv weights stored as (Cin, Cout); 3x3 stored as (9, Cin, Cout)
    #   with the 9 taps in (ky, kx) row-major order. Biases as (1, Cout).
    wsq = jax.random.normal(ks[1], (Cin, Csq), jnp.float32) * 0.2
    bsq = jax.random.normal(ks[2], (1, Csq), jnp.float32) * 0.1
    w1 = jax.random.normal(ks[3], (Csq, Ce1), jnp.float32) * 0.2
    b1 = jax.random.normal(ks[4], (1, Ce1), jnp.float32) * 0.1
    w3 = jax.random.normal(ks[5], (9, Csq, Ce3), jnp.float32) * 0.2
    b3 = jax.random.normal(ks[6], (1, Ce3), jnp.float32) * 0.1

    out = fire_pallas(x, wsq, bsq, w1, b1, w3, b3)
    out = jax.block_until_ready(out)

    ref = fire_reference(x, wsq, bsq, w1, b1, w3, b3)
    ref = jax.block_until_ready(ref)

    assert out.shape == (N, Ce1 + Ce3, H, W), out.shape
    np.testing.assert_allclose(np.asarray(out), np.asarray(ref),
                               rtol=1e-4, atol=1e-4)
    print("KERNEL_OK")
</pallas_src>

<mosaic_0001>
module attributes {stable_mosaic.version = 11 : i64} {
  func.func @fire_kernel(%arg0: i32, %arg1: memref<1x8x8x8xf32, #tpu.memory_space<vmem>>, %arg2: memref<8x8xf32, #tpu.memory_space<vmem>>, %arg3: memref<1x8xf32, #tpu.memory_space<vmem>>, %arg4: memref<72x32xf32, #tpu.memory_space<vmem>>, %arg5: memref<1x32xf32, #tpu.memory_space<vmem>>, %arg6: memref<1x8x8x32xf32, #tpu.memory_space<vmem>>, %arg7: memref<1x10x10x8xf32, #tpu.memory_space<vmem>>, %arg8: memref<64x72xf32, #tpu.memory_space<vmem>>) attributes {dimension_semantics = [#tpu.dimension_semantics<parallel>], iteration_bounds = array<i64: 2>, scalar_prefetch = 0 : i64, scratch_operands = 2 : i64, tpu.core_type = #tpu.core_type<tc>, window_params = [{transform_indices = @transform_0, window_bounds = array<i64: 1, 8, 8, 8>}, {pipeline_mode = #tpu.pipeline_mode<synchronous>, transform_indices = @transform_1, window_bounds = array<i64: 8, 8>}, {pipeline_mode = #tpu.pipeline_mode<synchronous>, transform_indices = @transform_2, window_bounds = array<i64: 1, 8>}, {pipeline_mode = #tpu.pipeline_mode<synchronous>, transform_indices = @transform_3, window_bounds = array<i64: 72, 32>}, {pipeline_mode = #tpu.pipeline_mode<synchronous>, transform_indices = @transform_4, window_bounds = array<i64: 1, 32>}, {transform_indices = @transform_5, window_bounds = array<i64: 1, 8, 8, 32>}]} {
    %c0 = arith.constant 0 : index
    %c0_0 = arith.constant 0 : index
    %c0_1 = arith.constant 0 : index
    %c0_2 = arith.constant 0 : index
    %0 = vector.load %arg1[%c0, %c0_0, %c0_1, %c0_2] : memref<1x8x8x8xf32, #tpu.memory_space<vmem>>, vector<1x8x8x8xf32>
    %1 = vector.shape_cast %0 : vector<1x8x8x8xf32> to vector<64x8xf32>
    %c0_3 = arith.constant 0 : index
    %c0_4 = arith.constant 0 : index
    %2 = vector.load %arg2[%c0_3, %c0_4] : memref<8x8xf32, #tpu.memory_space<vmem>>, vector<8x8xf32>
    %cst = arith.constant dense<0.000000e+00> : vector<64x8xf32>
    %3 = tpu.matmul %1, %2, %cst {dimension_numbers = #tpu.dot_dimension_numbers<[1], [0], [0], [1], [0, 0, 1, 1], [], []>} : vector<64x8xf32>, vector<8x8xf32>, vector<64x8xf32> -> vector<64x8xf32>
    %c0_5 = arith.constant 0 : index
    %c0_6 = arith.constant 0 : index
    %4 = vector.load %arg3[%c0_5, %c0_6] : memref<1x8xf32, #tpu.memory_space<vmem>>, vector<1x8xf32>
    %5 = vector.broadcast %4 : vector<1x8xf32> to vector<64x8xf32>
    %6 = arith.addf %3, %5 : vector<64x8xf32>
    %cst_7 = arith.constant 0.000000e+00 : f32
    %7 = vector.broadcast %cst_7 : f32 to vector<64x8xf32>
    %8 = arith.maximumf %6, %7 : vector<64x8xf32>
    %cst_8 = arith.constant 0.000000e+00 : f32
    %9 = vector.broadcast %cst_8 : f32 to vector<1x1x10x8xf32>
    %cst_9 = arith.constant 0.000000e+00 : f32
    %10 = vector.broadcast %cst_9 : f32 to vector<1x10x1x8xf32>
    %c0_10 = arith.constant 0 : index
    %c0_11 = arith.constant 0 : index
    %c0_12 = arith.constant 0 : index
    %c0_13 = arith.constant 0 : index
    %11 = vector.load %arg7[%c0_10, %c0_11, %c0_12, %c0_13] : memref<1x10x10x8xf32, #tpu.memory_space<vmem>>, vector<1x1x10x8xf32>
    tpu.vector_store %arg7[%c0_10, %c0_11, %c0_12, %c0_13], %9 {strides = array<i32>} : memref<1x10x10x8xf32, #tpu.memory_space<vmem>>, vector<1x1x10x8xf32>,
    %c0_14 = arith.constant 0 : index
    %c9 = arith.constant 9 : index
    %c0_15 = arith.constant 0 : index
    %c0_16 = arith.constant 0 : index
    %12 = vector.load %arg7[%c0_14, %c9, %c0_15, %c0_16] : memref<1x10x10x8xf32, #tpu.memory_space<vmem>>, vector<1x1x10x8xf32>
    tpu.vector_store %arg7[%c0_14, %c9, %c0_15, %c0_16], %9 {strides = array<i32>} : memref<1x10x10x8xf32, #tpu.memory_space<vmem>>, vector<1x1x10x8xf32>,
    %c0_17 = arith.constant 0 : index
    %c0_18 = arith.constant 0 : index
    %c0_19 = arith.constant 0 : index
    %c0_20 = arith.constant 0 : index
    %13 = vector.load %arg7[%c0_17, %c0_18, %c0_19, %c0_20] : memref<1x10x10x8xf32, #tpu.memory_space<vmem>>, vector<1x10x1x8xf32>
    tpu.vector_store %arg7[%c0_17, %c0_18, %c0_19, %c0_20], %10 {strides = array<i32>} : memref<1x10x10x8xf32, #tpu.memory_space<vmem>>, vector<1x10x1x8xf32>,
    %c0_21 = arith.constant 0 : index
    %c0_22 = arith.constant 0 : index
    %c9_23 = arith.constant 9 : index
    %c0_24 = arith.constant 0 : index
    %14 = vector.load %arg7[%c0_21, %c0_22, %c9_23, %c0_24] : memref<1x10x10x8xf32, #tpu.memory_space<vmem>>, vector<1x10x1x8xf32>
    tpu.vector_store %arg7[%c0_21, %c0_22, %c9_23, %c0_24], %10 {strides = array<i32>} : memref<1x10x10x8xf32, #tpu.memory_space<vmem>>, vector<1x10x1x8xf32>,
    %15 = vector.shape_cast %8 : vector<64x8xf32> to vector<1x8x8x8xf32>
    %c0_25 = arith.constant 0 : index
    %c1 = arith.constant 1 : index
    %c1_26 = arith.constant 1 : index
    %c0_27 = arith.constant 0 : index
    %16 = vector.load %arg7[%c0_25, %c1, %c1_26, %c0_27] : memref<1x10x10x8xf32, #tpu.memory_space<vmem>>, vector<1x8x8x8xf32>
    tpu.vector_store %arg7[%c0_25, %c1, %c1_26, %c0_27], %15 {strides = array<i32>} : memref<1x10x10x8xf32, #tpu.memory_space<vmem>>, vector<1x8x8x8xf32>,
    %c0_28 = arith.constant 0 : index
    %c0_29 = arith.constant 0 : index
    %c0_30 = arith.constant 0 : index
    %c0_31 = arith.constant 0 : index
    %17 = vector.load %arg7[%c0_28, %c0_29, %c0_30, %c0_31] : memref<1x10x10x8xf32, #tpu.memory_space<vmem>>, vector<1x8x8x8xf32>
    %18 = vector.shape_cast %17 : vector<1x8x8x8xf32> to vector<64x8xf32>
    %c0_32 = arith.constant 0 : index
    %c0_33 = arith.constant 0 : index
    %19 = vector.load %arg8[%c0_32, %c0_33] : memref<64x72xf32, #tpu.memory_space<vmem>>, vector<64x8xf32>
    tpu.vector_store %arg8[%c0_32, %c0_33], %18 {strides = array<i32>} : memref<64x72xf32, #tpu.memory_space<vmem>>, vector<64x8xf32>,
    %c0_34 = arith.constant 0 : index
    %c0_35 = arith.constant 0 : index
    %c1_36 = arith.constant 1 : index
    %c0_37 = arith.constant 0 : index
    %20 = vector.load %arg7[%c0_34, %c0_35, %c1_36, %c0_37] : memref<1x10x10x8xf32, #tpu.memory_space<vmem>>, vector<1x8x8x8xf32>
    %21 = vector.shape_cast %20 : vector<1x8x8x8xf32> to vector<64x8xf32>
    %c0_38 = arith.constant 0 : index
    %c8 = arith.constant 8 : index
    %22 = vector.load %arg8[%c0_38, %c8] : memref<64x72xf32, #tpu.memory_space<vmem>>, vector<64x8xf32>
    tpu.vector_store %arg8[%c0_38, %c8], %21 {strides = array<i32>} : memref<64x72xf32, #tpu.memory_space<vmem>>, vector<64x8xf32>,
    %c0_39 = arith.constant 0 : index
    %c0_40 = arith.constant 0 : index
    %c2 = arith.constant 2 : index
    %c0_41 = arith.constant 0 : index
    %23 = vector.load %arg7[%c0_39, %c0_40, %c2, %c0_41] : memref<1x10x10x8xf32, #tpu.memory_space<vmem>>, vector<1x8x8x8xf32>
    %24 = vector.shape_cast %23 : vector<1x8x8x8xf32> to vector<64x8xf32>
    %c0_42 = arith.constant 0 : index
    %c16 = arith.constant 16 : index
    %25 = vector.load %arg8[%c0_42, %c16] : memref<64x72xf32, #tpu.memory_space<vmem>>, vector<64x8xf32>
    tpu.vector_store %arg8[%c0_42, %c16], %24 {strides = array<i32>} : memref<64x72xf32, #tpu.memory_space<vmem>>, vector<64x8xf32>,
    %c0_43 = arith.constant 0 : index
    %c1_44 = arith.constant 1 : index
    %c0_45 = arith.constant 0 : index
    %c0_46 = arith.constant 0 : index
    %26 = vector.load %arg7[%c0_43, %c1_44, %c0_45, %c0_46] : memref<1x10x10x8xf32, #tpu.memory_space<vmem>>, vector<1x8x8x8xf32>
    %27 = vector.shape_cast %26 : vector<1x8x8x8xf32> to vector<64x8xf32>
    %c0_47 = arith.constant 0 : index
    %c24 = arith.constant 24 : index
    %28 = vector.load %arg8[%c0_47, %c24] : memref<64x72xf32, #tpu.memory_space<vmem>>, vector<64x8xf32>
    tpu.vector_store %arg8[%c0_47, %c24], %27 {strides = array<i32>} : memref<64x72xf32, #tpu.memory_space<vmem>>, vector<64x8xf32>,
    %c0_48 = arith.constant 0 : index
    %c1_49 = arith.constant 1 : index
    %c1_50 = arith.constant 1 : index
    %c0_51 = arith.constant 0 : index
    %29 = vector.load %arg7[%c0_48, %c1_49, %c1_50, %c0_51] : memref<1x10x10x8xf32, #tpu.memory_space<vmem>>, vector<1x8x8x8xf32>
    %30 = vector.shape_cast %29 : vector<1x8x8x8xf32> to vector<64x8xf32>
    %c0_52 = arith.constant 0 : index
    %c32 = arith.constant 32 : index
    %31 = vector.load %arg8[%c0_52, %c32] : memref<64x72xf32, #tpu.memory_space<vmem>>, vector<64x8xf32>
    tpu.vector_store %arg8[%c0_52, %c32], %30 {strides = array<i32>} : memref<64x72xf32, #tpu.memory_space<vmem>>, vector<64x8xf32>,
    %c0_53 = arith.constant 0 : index
    %c1_54 = arith.constant 1 : index
    %c2_55 = arith.constant 2 : index
    %c0_56 = arith.constant 0 : index
    %32 = vector.load %arg7[%c0_53, %c1_54, %c2_55, %c0_56] : memref<1x10x10x8xf32, #tpu.memory_space<vmem>>, vector<1x8x8x8xf32>
    %33 = vector.shape_cast %32 : vector<1x8x8x8xf32> to vector<64x8xf32>
    %c0_57 = arith.constant 0 : index
    %c40 = arith.constant 40 : index
    %34 = vector.load %arg8[%c0_57, %c40] : memref<64x72xf32, #tpu.memory_space<vmem>>, vector<64x8xf32>
    tpu.vector_store %arg8[%c0_57, %c40], %33 {strides = array<i32>} : memref<64x72xf32, #tpu.memory_space<vmem>>, vector<64x8xf32>,
    %c0_58 = arith.constant 0 : index
    %c2_59 = arith.constant 2 : index
    %c0_60 = arith.constant 0 : index
    %c0_61 = arith.constant 0 : index
    %35 = vector.load %arg7[%c0_58, %c2_59, %c0_60, %c0_61] : memref<1x10x10x8xf32, #tpu.memory_space<vmem>>, vector<1x8x8x8xf32>
    %36 = vector.shape_cast %35 : vector<1x8x8x8xf32> to vector<64x8xf32>
    %c0_62 = arith.constant 0 : index
    %c48 = arith.constant 48 : index
    %37 = vector.load %arg8[%c0_62, %c48] : memref<64x72xf32, #tpu.memory_space<vmem>>, vector<64x8xf32>
    tpu.vector_store %arg8[%c0_62, %c48], %36 {strides = array<i32>} : memref<64x72xf32, #tpu.memory_space<vmem>>, vector<64x8xf32>,
    %c0_63 = arith.constant 0 : index
    %c2_64 = arith.constant 2 : index
    %c1_65 = arith.constant 1 : index
    %c0_66 = arith.constant 0 : index
    %38 = vector.load %arg7[%c0_63, %c2_64, %c1_65, %c0_66] : memref<1x10x10x8xf32, #tpu.memory_space<vmem>>, vector<1x8x8x8xf32>
    %39 = vector.shape_cast %38 : vector<1x8x8x8xf32> to vector<64x8xf32>
    %c0_67 = arith.constant 0 : index
    %c56 = arith.constant 56 : index
    %40 = vector.load %arg8[%c0_67, %c56] : memref<64x72xf32, #tpu.memory_space<vmem>>, vector<64x8xf32>
    tpu.vector_store %arg8[%c0_67, %c56], %39 {strides = array<i32>} : memref<64x72xf32, #tpu.memory_space<vmem>>, vector<64x8xf32>,
    %c0_68 = arith.constant 0 : index
    %c2_69 = arith.constant 2 : index
    %c2_70 = arith.constant 2 : index
    %c0_71 = arith.constant 0 : index
    %41 = vector.load %arg7[%c0_68, %c2_69, %c2_70, %c0_71] : memref<1x10x10x8xf32, #tpu.memory_space<vmem>>, vector<1x8x8x8xf32>
    %42 = vector.shape_cast %41 : vector<1x8x8x8xf32> to vector<64x8xf32>
    %c0_72 = arith.constant 0 : index
    %c64 = arith.constant 64 : index
    %43 = vector.load %arg8[%c0_72, %c64] : memref<64x72xf32, #tpu.memory_space<vmem>>, vector<64x8xf32>
    tpu.vector_store %arg8[%c0_72, %c64], %42 {strides = array<i32>} : memref<64x72xf32, #tpu.memory_space<vmem>>, vector<64x8xf32>,
    %c0_73 = arith.constant 0 : index
    %c0_74 = arith.constant 0 : index
    %44 = vector.load %arg8[%c0_73, %c0_74] : memref<64x72xf32, #tpu.memory_space<vmem>>, vector<64x72xf32>
    %c0_75 = arith.constant 0 : index
    %c0_76 = arith.constant 0 : index
    %45 = vector.load %arg4[%c0_75, %c0_76] : memref<72x32xf32, #tpu.memory_space<vmem>>, vector<72x32xf32>
    %cst_77 = arith.constant dense<0.000000e+00> : vector<64x32xf32>
    %46 = tpu.matmul %44, %45, %cst_77 {dimension_numbers = #tpu.dot_dimension_numbers<[1], [0], [0], [1], [0, 0, 1, 1], [], []>} : vector<64x72xf32>, vector<72x32xf32>, vector<64x32xf32> -> vector<64x32xf32>
    %c0_78 = arith.constant 0 : index
    %c0_79 = arith.constant 0 : index
    %47 = vector.load %arg5[%c0_78, %c0_79] : memref<1x32xf32, #tpu.memory_space<vmem>>, vector<1x32xf32>
    %48 = vector.broadcast %47 : vector<1x32xf32> to vector<64x32xf32>
    %49 = arith.addf %46, %48 : vector<64x32xf32>
    %cst_80 = arith.constant 0.000000e+00 : f32
    %50 = vector.broadcast %cst_80 : f32 to vector<64x32xf32>
    %51 = arith.maximumf %49, %50 : vector<64x32xf32>
    %52 = vector.shape_cast %51 : vector<64x32xf32> to vector<1x8x8x32xf32>
    %c0_81 = arith.constant 0 : index
    %c0_82 = arith.constant 0 : index
    %c0_83 = arith.constant 0 : index
    %c0_84 = arith.constant 0 : index
    %53 = vector.load %arg6[%c0_81, %c0_82, %c0_83, %c0_84] : memref<1x8x8x32xf32, #tpu.memory_space<vmem>>, vector<1x8x8x32xf32>
    tpu.vector_store %arg6[%c0_81, %c0_82, %c0_83, %c0_84], %52 {strides = array<i32>} : memref<1x8x8x32xf32, #tpu.memory_space<vmem>>, vector<1x8x8x32xf32>,
    return
  }
  func.func @transform_0(%arg0: i32) -> (i32, i32, i32, i32) {
    %c0_i32 = arith.constant 0 : i32
    %c0_i32_0 = arith.constant 0 : i32
    %c0_i32_1 = arith.constant 0 : i32
    %c0_i32_2 = arith.constant 0 : i32
    return %arg0, %c0_i32, %c0_i32_0, %c0_i32_1 : i32, i32, i32, i32
  }
  func.func @transform_1(%arg0: i32) -> (i32, i32) {
    %c0_i32 = arith.constant 0 : i32
    %c0_i32_0 = arith.constant 0 : i32
    %c0_i32_1 = arith.constant 0 : i32
    return %c0_i32, %c0_i32_0 : i32, i32
  }
  func.func @transform_2(%arg0: i32) -> (i32, i32) {
    %c0_i32 = arith.constant 0 : i32
    %c0_i32_0 = arith.constant 0 : i32
    %c0_i32_1 = arith.constant 0 : i32
    return %c0_i32, %c0_i32_0 : i32, i32
  }
  func.func @transform_3(%arg0: i32) -> (i32, i32) {
    %c0_i32 = arith.constant 0 : i32
    %c0_i32_0 = arith.constant 0 : i32
    %c0_i32_1 = arith.constant 0 : i32
    return %c0_i32, %c0_i32_0 : i32, i32
  }
  func.func @transform_4(%arg0: i32) -> (i32, i32) {
    %c0_i32 = arith.constant 0 : i32
    %c0_i32_0 = arith.constant 0 : i32
    %c0_i32_1 = arith.constant 0 : i32
    return %c0_i32, %c0_i32_0 : i32, i32
  }
  func.func @transform_5(%arg0: i32) -> (i32, i32, i32, i32) {
    %c0_i32 = arith.constant 0 : i32
    %c0_i32_0 = arith.constant 0 : i32
    %c0_i32_1 = arith.constant 0 : i32
    %c0_i32_2 = arith.constant 0 : i32
    return %arg0, %c0_i32, %c0_i32_0, %c0_i32_1 : i32, i32, i32, i32
  }
}

</mosaic_0001>

<bundles_post_ra>
// kernel: fire_pallas.1
= control target key start
LH: loop header
LB: loop body
LE: loop exit
PB: predicated region body
PF: predicated region fallthrough
CT: control target
= control target key end

     0   :  { %10 = vsyncpa [#allocation5], 0  ;;  %s1706_s0 = inlined_call_operand.vmem [shape: f32[2,8,8,8], index: 0, kind: input, shape index: {}]   ;;  %s1707_s1 = inlined_call_operand.vmem [shape: f32[8,8], index: 1, kind: input, shape index: {}]   ;;  %s1708_s2 = inlined_call_operand.vmem [shape: f32[1,8], index: 2, kind: input, shape index: {}]   ;;  %s1709_s3 = inlined_call_operand.vmem [shape: f32[72,32], index: 3, kind: input, shape index: {}]   ;;  %s1710_s4 = inlined_call_operand.vmem [shape: f32[1,32], index: 4, kind: input, shape index: {}]   ;;  %s1711_s5 = inlined_call_operand.hbm [shape: f32[2,8,8,32], index: 5, kind: output, shape index: {}]  }
   0x1   :  { %12 = vsyncpa [#allocation5 + $0x1], 0  ;;  %s1351_s18 = smov 0   ;;  %s1353_s19 = smov 0  }
   0x2   :  { %s1355_s20 = smov 0   ;;  %s1357_s21 = smov 0  }
   0x3 LB: > { %s1372_s22 = sadd.s32 4294967295, %s1308_s21   ;;  %s1069_s23 = sadd.s32 4294967294, %s1308_s21   ;;  %s1308_s21 = sphi %s1357_s21, %s1717_s21   ;;  %s1304_s20 = sphi %s1355_s20, %s1716_s20   ;;  %s1300_s19 = sphi %s1353_s19, %s1715_s19   ;;  %s1296_s18 = sphi %s1351_s18, %s1714_s18  }
   0x4   : > { %s1376_s24 = sadd.s32 1, %s1308_s21   ;;  %s135_s25 = sadd.s32 1, %s1304_s20 }
   0x5   : > { %s132_s26 = ssub.s32 %s1308_s21, %s1376_s24  ;;  %p145_p0 = scmp.ne.s32.totalorder %s1304_s20, %s1300_s19 }
   0x6   : > { %p133_p1 = scmp.eq.s32.totalorder %s132_s26, 0  ;;  %p146_p2 = scmp.eq.s32.totalorder %s1372_s22, 1 }
   0x7   : > { %p151_p3 = scmp.ne.s32.totalorder %s1300_s19, %s1296_s18  ;;  %p152_p4 = scmp.eq.s32.totalorder %s1069_s23, 1 }
   0x8   : > { %s1387_s27 = scalar_select %p133_p1, %s1304_s20, %s135_s25  }
   0x9   : > { %p1389_p5 = por %p146_p2, %p145_p0  ;;  %p1393_p6 = por %p152_p4, %p151_p3 }
   0xa   : > { %p1072_p7 = scmp.ge.s32.totalorder %s1308_s21, 1  ;;  %p190_p8 = scmp.lt.s32.totalorder %s1308_s21, 3 }
   0xc   : > { %p191_p9 = pnand %p1072_p7, %p190_p8 }
   0xd   : > { %v231_v0 = vld [vmem:[%s1707_s1] sm:$0xff] (!%p191_p9)  ;;  %p218_p10 = scmp.lt.s32.totalorder (!%p191_p9), %s1372_s22, 1  ;;  %vm239_vm0 = vcmask (!%p191_p9), 64512   ;;  %vm378_vm1 = vcmask (!%p191_p9), 58368   ;;  %v1310_v9 = vmov (!%p191_p9), 0.0   ;;  %vm383_vm2 = vcmask (!%p191_p9), 57344  }
   0xe   : > { %194 = sbr.rel (%p191_p9) target bundleno = 727 (0x2d7), region = 40  ;;  %1127 = vmatprep.subr.mxu0 (!%p191_p9), %v231_v0  ;;  %377 = vst.msk [vmem:[#allocation2] sm:$0xff] (!%p191_p9), %vm239_vm0, %v1310_v9  ;;  %381 = vst.msk [vmem:[#allocation2 + $0x90] sm:$0xff] (!%p191_p9), %vm239_vm0, %v1310_v9  ;;  %s1311_s12 = smov (!%p191_p9), 16   ;;  %vm469_vm3 = vcmask (!%p191_p9), 130112   ;;  %vm518_vm4 = vcmask (!%p191_p9), 195712  }
   0xf   : > { %1128 = vmatpush3.msra.mxu0 (!%p191_p9), %v231_v0  ;;  %379 = vst.msk [vmem:[#allocation2 + $0x8] sm:$0x3] (!%p191_p9), %vm378_vm1, %v1310_v9  ;;  %382 = vst.msk [vmem:[#allocation2 + $0x98] sm:$0x3] (!%p191_p9), %vm378_vm1, %v1310_v9  ;;  %s1312_s13 = smov (!%p191_p9), 48   ;;  %s1313_s14 = smov (!%p191_p9), 8  }
  0x10   : > { %394 = vst.msk [vmem:[#allocation2 + $0x9] sm:$0x1] (!%p191_p9), %vm383_vm2, %v1310_v9  ;;  %384 = vst.msk [vmem:[#allocation2] sm:$0x1] (!%p191_p9), %vm383_vm2, %v1310_v9  ;;  %s1314_s15 = smov (!%p191_p9), 56   ;;  %s1315_s23 = smov (!%p191_p9), 24  }
  0x11   : > { %385 = vst.msk [vmem:[#allocation2 + $0x10] sm:$0x1] (!%p191_p9), %vm383_vm2, %v1310_v9  ;;  %386 = vst.msk [vmem:[#allocation2 + $0x20] sm:$0x1] (!%p191_p9), %vm383_vm2, %v1310_v9  ;;  %v1076_v17 = vld [vmem:[%s1708_s2] ss:$0 sm:$0xff] (!%p191_p9) }
  0x12   : > { %387 = vst.msk [vmem:[#allocation2 + $0x30] sm:$0x1] (!%p191_p9), %vm383_vm2, %v1310_v9  ;;  %388 = vst.msk [vmem:[#allocation2 + $0x40] sm:$0x1] (!%p191_p9), %vm383_vm2, %v1310_v9  ;;  %s1316_s25 = smov (!%p191_p9), 40   ;;  %s1317_s26 = smov (!%p191_p9), 32  }
  0x13   : > { %389 = vst.msk [vmem:[#allocation2 + $0x50] sm:$0x1] (!%p191_p9), %vm383_vm2, %v1310_v9  ;;  %390 = vst.msk [vmem:[#allocation2 + $0x60] sm:$0x1] (!%p191_p9), %vm383_vm2, %v1310_v9  ;;  %s1318_s30 = smov (!%p191_p9), 64   ;;  %v830_v59 = vld [vmem:[%s1709_s3] sm:$0xff] (!%p191_p9) }
  0x14   : > { %391 = vst.msk [vmem:[#allocation2 + $0x70] sm:$0x1] (!%p191_p9), %vm383_vm2, %v1310_v9  ;;  %392 = vst.msk [vmem:[#allocation2 + $0x80] sm:$0x1] (!%p191_p9), %vm383_vm2, %v1310_v9  ;;  %v831_v60 = vld [vmem:[%s1709_s3 + $0x8] sm:$0xff] (!%p191_p9)  ;;  %v832_v62 = vld [vmem:[%s1709_s3 + $0x10] sm:$0xff] (!%p191_p9) }
  0x15   : > { %s219_s7 = scalar_select %p218_p10, %s1372_s22, 1  ;;  %395 = vst.msk [vmem:[#allocation2 + $0x19] sm:$0x1] %vm383_vm2, %v1310_v9  ;;  %396 = vst.msk [vmem:[#allocation2 + $0x29] sm:$0x1] %vm383_vm2, %v1310_v9  ;;  %v1171_v61 = vpack.c.bf16 %v831_v60, %v830_v59  ;;  %v833_v63 = vld [vmem:[%s1709_s3 + $0x18] sm:$0xff] }
  0x16   : > { %397 = vst.msk [vmem:[#allocation2 + $0x39] sm:$0x1] %vm383_vm2, %v1310_v9  ;;  %398 = vst.msk [vmem:[#allocation2 + $0x49] sm:$0x1] %vm383_vm2, %v1310_v9  ;;  %v429_v12 = vld [vmem:[#allocation2 + $0x1] sm:$0xff]  ;;  %v731_v13 = vld [vmem:[#allocation2 + $0x91] sm:$0xff]  ;;  %v1175_v0 = vpack.c.bf16 %v833_v63, %v832_v62 }
  0x17   : > { %s1099_s8 = sshll.u32 %s219_s7, 6  ;;  %399 = vst.msk [vmem:[#allocation2 + $0x59] sm:$0x1] %vm383_vm2, %v1310_v9  ;;  %400 = vst.msk [vmem:[#allocation2 + $0x69] sm:$0x1] %vm383_vm2, %v1310_v9  ;;  %v478_v10 = vld [vmem:[#allocation2 + $0x2] sm:$0xff]  ;;  %445 = vrot.lane.b32.xlu0 %v429_v12, %s1313_s14  ;;  %1187 = vmatprep.subr.bf16.mxu1 %v1171_v61 }
  0x18   : > { %s222_s11 = scalar_lea.vmem %s1706_s0, %s1099_s8  ;;  %401 = vst.msk [vmem:[#allocation2 + $0x79] sm:$0x1] %vm383_vm2, %v1310_v9  ;;  %402 = vst.msk [vmem:[#allocation2 + $0x89] sm:$0x1] %vm383_vm2, %v1310_v9  ;;  %494 = vrot.lane.b32.xlu1 %v478_v10, %s1311_s12  ;;  %v413_v15 = vld [vmem:[#allocation2] sm:$0xff]  ;;  %1172 = vmatprep.subr.bf16.mxu0 %v1171_v61  ;;  %vm567_vm5 = vcmask 261312  }
  0x19   : > { %v223_v1 = vld [vmem:[%s222_s11] sm:$0xff]  ;;  %v224_v2 = vld [vmem:[%s222_s11 + $0x8] sm:$0xff]  ;;  %v225_v3 = vld [vmem:[%s222_s11 + $0x10] sm:$0xff]  ;;  %393 = vst.msk [vmem:[#allocation2 + $0x90] sm:$0x1] %vm383_vm2, %v1310_v9  ;;  %1192 = vmatpush3.bf16.msra.mxu1 %v1171_v61  ;;  %vm616_vm6 = vcmask 326912  }
  0x1a   : > { %1129 = vmatprep.mubr.msk.f32.mxu0 %vm239_vm0, %v223_v1  ;;  %v226_v4 = vld [vmem:[%s222_s11 + $0x18] sm:$0xff]  ;;  %v227_v5 = vld [vmem:[%s222_s11 + $0x20] sm:$0xff]  ;;  %v228_v6 = vld [vmem:[%s222_s11 + $0x28] sm:$0xff]  ;;  %403 = vst.msk [vmem:[#allocation2 + $0x99] sm:$0x1] %vm383_vm2, %v1310_v9  ;;  %1188 = vmatprep.subr.bf16.mxu1 %v1175_v0  ;;  %vm665_vm7 = vcmask 392512  }
  0x1b   : > { %1130 = vmatmul.mubr.msk.f32.vlgmr.msra.gmra.mrb[0].mxu0 %vm239_vm0, %v224_v2  ;;  %v229_v7 = vld [vmem:[%s222_s11 + $0x30] sm:$0xff]  ;;  %v230_v8 = vld [vmem:[%s222_s11 + $0x38] sm:$0xff]  ;;  %421 = vst.msk [vmem:[#allocation3] sm:$0xff] %vm239_vm0, %v413_v15  ;;  %v834_v1 = vld [vmem:[%s1709_s3 + $0x20] sm:$0xff]  ;;  %vm715_vm8 = vcmask 458112   ;;  %vm764_vm9 = vcmask 523712  }
  0x1c   : > { %1132 = vmatprep.mubr.msk.f32.mxu0 %vm239_vm0, %v225_v3  ;;  %1174 = vmatpush3.bf16.msra.mxu0 %v1171_v61  ;;  %v835_v2 = vld [vmem:[%s1709_s3 + $0x28] sm:$0xff]  ;;  %v838_v9 = vld [vmem:[%s1709_s3 + $0x40] sm:$0xff]  ;;  %vm813_vm10 = vcmask 589312   ;;  %vm846_vm11 = vcmask 588800   ;;  %vm984_vm12 = vcmask 261120   ;;  %s1319_s16 = smov [#allocation4]  }
  0x1d   : > { %1176 = vmatprep.subr.bf16.mxu0 %v1175_v0  ;;  %1193 = vmatpush3.bf16.msra.mxu1 %v1175_v0  ;;  %s1250_s17 = sshll.u32 %s1319_s16, 4  ;;  %s1251_s17 = int_to_ptr.vmem [resolvable:$false] %s1250_s17 }
  0x1e   : > { %s1252_s6 = scalar_lea.vmem %s1251_s17, 2048 }
  0x1f   : > { %1133 = vmatmul.mubr.msk.f32.gmra.mrb[2].mxu0 %vm239_vm0, %v226_v4  ;;  %v1179_v4 = vpack.c.bf16 %v835_v2, %v834_v1 }
  0x20   : > { %1135 = vmatprep.mubr.msk.f32.mxu0 %vm239_vm0, %v227_v5  ;;  %v682_v11 = vld [vmem:[#allocation2 + $0x90] sm:$0xff]  ;;  %1178 = vmatpush3.bf16.msra.mxu0 %v1175_v0 }
  0x21   : > { %705 = vrot.lane.b32.xlu1 %v682_v11, %s1312_s13  ;;  %1189 = vmatprep.subr.bf16.mxu1 %v1179_v4  ;;  %v836_v5 = vld [vmem:[%s1709_s3 + $0x30] sm:$0xff] }
  0x22   : > { %1180 = vmatprep.subr.bf16.mxu0 %v1179_v4  ;;  %1194 = vmatpush3.bf16.msra.mxu1 %v1179_v4 }
  0x23   : > { %1136 = vmatmul.mubr.msk.f32.gmra.mrb[4].mxu0 %vm239_vm0, %v228_v6  ;;  %v837_v6 = vld [vmem:[%s1709_s3 + $0x38] sm:$0xff] }
  0x24   : > { %1138 = vmatprep.mubr.msk.f32.mxu0 %vm239_vm0, %v229_v7  ;;  %1182 = vmatpush3.bf16.msra.mxu0 %v1179_v4 }
  0x25   : > { %754 = vrot.lane.b32.xlu1 %v731_v13, %s1314_s15 }
  0x27   : > { %1139 = vmatmul.mubr.msk.f32.gmra.mrb[6].mxu0 %vm239_vm0, %v230_v8  ;;  %v1183_v8 = vpack.c.bf16 %v837_v6, %v836_v5 }
  0x29   : > { %1190 = vmatprep.subr.bf16.mxu1 %v1183_v8  ;;  %1184 = vmatprep.subr.bf16.mxu0 %v1183_v8 }
  0x2a   : > { %1195 = vmatpush3.bf16.msra.mxu1 %v1183_v8  ;;  %1186 = vmatpush3.bf16.msra.mxu0 %v1183_v8 }
  0x2b   : > { %1191 = vmatprep.subr.mxu1 %v838_v9  ;;  %1157 = vmatprep.subr.mxu0 %v838_v9 }
  0x2e   : > { %1196 = vmatpush3.msra.mxu1 %v838_v9  ;;  %1158 = vmatpush3.msra.mxu0 %v838_v9 }
  0x89   : > { %v446_v14 = vpop.permute.xlu0 %445 }
  0x8a   : > { %v495_v16 = vpop.permute.xlu1 %494  ;;  %470 = vst.msk [vmem:[#allocation3] sm:$0xff] %vm469_vm3, %v446_v14 }
  0x8b   : > { %519 = vst.msk [vmem:[#allocation3] sm:$0xff] %vm518_vm4, %v495_v16 }
  0x93   : > { %v1554_v14 = vpop.permute.xlu1 %705 }
  0x97   : > { %v1561_v16 = vpop.permute.xlu1 %754 }
  0xee   : > { %v1131_v18 = vpop.f32.mrb[0].mxu0 }
  0xef   : > { %v336_v19 = vadd.f32 %v1131_v18, %v1076_v17  ;;  %v330_v20 = vpop.f32.mrb[1].mxu0 }
  0xf0   : > { %v331_v21 = vadd.f32 %v1076_v17, %v330_v20 }
  0xf1   : > { %v370_v22 = vmax.f32 %v336_v19, 0.0 }
  0xf2   : > { %v369_v23 = vmax.f32 %v331_v21, 0.0  ;;  %v1134_v24 = vpop.f32.mrb[2].mxu0 }
  0xf3   : > { %406 = vst.msk [vmem:[#allocation2 + $0x21] sm:$0xff] %vm239_vm0, %v370_v22  ;;  %v346_v25 = vadd.f32 %v1134_v24, %v1076_v17  ;;  %v340_v26 = vpop.f32.mrb[3].mxu0 }
  0xf4   : > { %405 = vst.msk [vmem:[#allocation2 + $0x11] sm:$0xff] %vm239_vm0, %v369_v23  ;;  %v341_v27 = vadd.f32 %v1076_v17, %v340_v26 }
  0xf5   : > { %v372_v28 = vmax.f32 %v346_v25, 0.0 }
  0xf6   : > { %v371_v29 = vmax.f32 %v341_v27, 0.0  ;;  %v1137_v30 = vpop.f32.mrb[4].mxu0 }
  0xf7   : > { %408 = vst.msk [vmem:[#allocation2 + $0x41] sm:$0xff] %vm239_vm0, %v372_v28  ;;  %v356_v31 = vadd.f32 %v1137_v30, %v1076_v17  ;;  %v350_v32 = vpop.f32.mrb[5].mxu0 }
  0xf8   : > { %407 = vst.msk [vmem:[#allocation2 + $0x31] sm:$0xff] %vm239_vm0, %v371_v29  ;;  %v351_v33 = vadd.f32 %v1076_v17, %v350_v32 }
  0xf9   : > { %v374_v34 = vmax.f32 %v356_v31, 0.0 }
  0xfa   : > { %v480_v35 = vld [vmem:[#allocation2 + $0x22] sm:$0xff]  ;;  %v373_v38 = vmax.f32 %v351_v33, 0.0  ;;  %v1140_v39 = vpop.f32.mrb[6].mxu0 }
  0xfb   : > { %v431_v36 = vld [vmem:[#allocation2 + $0x21] sm:$0xff]  ;;  %498 = vrot.lane.b32.xlu1 %v480_v35, %s1311_s12  ;;  %v527_v40 = vld [vmem:[#allocation2 + $0x10] sm:$0xff]  ;;  %410 = vst.msk [vmem:[#allocation2 + $0x61] sm:$0xff] %vm239_vm0, %v374_v34  ;;  %v366_v41 = vadd.f32 %v1140_v39, %v1076_v17  ;;  %v360_v42 = vpop.f32.mrb[7].mxu0 }
  0xfc   : > { %v528_v37 = vld [vmem:[#allocation2 + $0x20] sm:$0xff]  ;;  %449 = vrot.lane.b32.xlu0 %v431_v36, %s1313_s14  ;;  %409 = vst.msk [vmem:[#allocation2 + $0x51] sm:$0xff] %vm239_vm0, %v373_v38  ;;  %v361_v43 = vadd.f32 %v1076_v17, %v360_v42  ;;  %422 = vst.msk [vmem:[#allocation3 + $0x8] sm:$0xff] %vm239_vm0, %v527_v40  ;;  %v430_v50 = vld [vmem:[#allocation2 + $0x11] sm:$0xff] }
  0xfd   : > { %423 = vst.msk [vmem:[#allocation3 + $0x10] sm:$0xff] %vm239_vm0, %v528_v37  ;;  %v376_v44 = vmax.f32 %v366_v41, 0.0  ;;  %v479_v52 = vld [vmem:[#allocation2 + $0x12] sm:$0xff] }
  0xfe   : > { %v530_v45 = vld [vmem:[#allocation2 + $0x40] sm:$0xff]  ;;  %v375_v46 = vmax.f32 %v361_v43, 0.0  ;;  %v780_v17 = vld [vmem:[#allocation2 + $0x92] sm:$0xff] }
  0xff   : > { %545 = vrot.lane.b32.xlu1 %v528_v37, %s1315_s23  ;;  %v529_v47 = vld [vmem:[#allocation2 + $0x30] sm:$0xff]  ;;  %412 = vst.msk [vmem:[#allocation2 + $0x81] sm:$0xff] %vm239_vm0, %v376_v44  ;;  %425 = vst.msk [vmem:[#allocation3 + $0x20] sm:$0xff] %vm239_vm0, %v530_v45  ;;  %v579_v53 = vld [vmem:[#allocation2 + $0x41] sm:$0xff] }
 0x100   : > { %643 = vrot.lane.b32.xlu0 %v480_v35, %s1316_s25  ;;  %411 = vst.msk [vmem:[#allocation2 + $0x71] sm:$0xff] %vm239_vm0, %v375_v46  ;;  %424 = vst.msk [vmem:[#allocation3 + $0x18] sm:$0xff] %vm239_vm0, %v529_v47  ;;  %v628_v54 = vld [vmem:[#allocation2 + $0x42] sm:$0xff]  ;;  %v432_v55 = vld [vmem:[#allocation2 + $0x31] sm:$0xff] }
 0x101   : > { %v1496_v58 = vld [vmem:[#allocation2 + $0x32] sm:$0xff] }
 0x102   : > { %v532_v48 = vld [vmem:[#allocation2 + $0x60] sm:$0xff] }
 0x103   : > { %594 = vrot.lane.b32.xlu1 %v431_v36, %s1317_s26  ;;  %v1465_v49 = vld [vmem:[#allocation2 + $0x50] sm:$0xff]  ;;  %427 = vst.msk [vmem:[#allocation3 + $0x30] sm:$0xff] %vm239_vm0, %v532_v48  ;;  %v581_v56 = vld [vmem:[#allocation2 + $0x61] sm:$0xff] }
 0x104   : > { %691 = vrot.lane.b32.xlu0 %v528_v37, %s1312_s13  ;;  %426 = vst.msk [vmem:[#allocation3 + $0x28] sm:$0xff] %vm239_vm0, %v1465_v49  ;;  %v484_v57 = vld [vmem:[#allocation2 + $0x62] sm:$0xff]  ;;  %v434_v3 = vld [vmem:[#allocation2 + $0x51] sm:$0xff] }
 0x105   : > { %v483_v7 = vld [vmem:[#allocation2 + $0x52] sm:$0xff] }
 0x106   : > { %v632_v10 = vld [vmem:[#allocation2 + $0x82] sm:$0xff] }
 0x107   : > { %447 = vrot.lane.b32.xlu1 %v430_v50, %s1313_s14  ;;  %v1472_v51 = vld [vmem:[#allocation2 + $0x70] sm:$0xff]  ;;  %v681_v11 = vld [vmem:[#allocation2 + $0x80] sm:$0xff] }
 0x108   : > { %740 = vrot.lane.b32.xlu0 %v431_v36, %s1314_s15  ;;  %428 = vst.msk [vmem:[#allocation3 + $0x38] sm:$0xff] %vm239_vm0, %v1472_v51  ;;  %v730_v12 = vld [vmem:[#allocation2 + $0x81] sm:$0xff]  ;;  %v436_v13 = vld [vmem:[#allocation2 + $0x71] sm:$0xff] }
 0x109   : > { %v485_v15 = vld [vmem:[#allocation2 + $0x72] sm:$0xff] }
 0x10b   : > { %496 = vrot.lane.b32.xlu1 %v479_v52, %s1311_s12 }
 0x10c   : > { %789 = vrot.lane.b32.xlu0 %v480_v35, %s1318_s30 }
 0x10f   : > { %543 = vrot.lane.b32.xlu1 %v527_v40, %s1315_s23 }
 0x110   : > { %598 = vrot.lane.b32.xlu0 %v579_v53, %s1317_s26 }
 0x113   : > { %592 = vrot.lane.b32.xlu1 %v430_v50, %s1317_s26 }
 0x114   : > { %647 = vrot.lane.b32.xlu0 %v628_v54, %s1316_s25 }
 0x117   : > { %641 = vrot.lane.b32.xlu1 %v479_v52, %s1316_s25 }
 0x118   : > { %451 = vrot.lane.b32.xlu0 %v432_v55, %s1313_s14 }
 0x11b   : > { %549 = vrot.lane.b32.xlu1 %v530_v45, %s1315_s23 }
 0x11c   : > { %547 = vrot.lane.b32.xlu0 %v529_v47, %s1315_s23 }
 0x11f   : > { %453 = vrot.lane.b32.xlu1 %v579_v53, %s1313_s14 }
 0x120   : > { %596 = vrot.lane.b32.xlu0 %v432_v55, %s1317_s26 }
 0x123   : > { %502 = vrot.lane.b32.xlu1 %v628_v54, %s1311_s12 }
 0x124   : > { %693 = vrot.lane.b32.xlu0 %v529_v47, %s1312_s13 }
 0x127   : > { %695 = vrot.lane.b32.xlu1 %v530_v45, %s1312_s13 }
 0x128   : > { %742 = vrot.lane.b32.xlu0 %v432_v55, %s1314_s15 }
 0x12b   : > { %744 = vrot.lane.b32.xlu1 %v579_v53, %s1314_s15 }
 0x12c   : > { %553 = vrot.lane.b32.xlu0 %v532_v48, %s1315_s23 }
 0x12f   : > { %793 = vrot.lane.b32.xlu1 %v628_v54, %s1318_s30 }
 0x130   : > { %602 = vrot.lane.b32.xlu0 %v581_v56, %s1317_s26 }
 0x133   : > { %500 = vrot.lane.b32.xlu1 %v1496_v58, %s1311_s12 }
 0x134   : > { %506 = vrot.lane.b32.xlu0 %v484_v57, %s1311_s12 }
 0x137   : > { %645 = vrot.lane.b32.xlu1 %v1496_v58, %s1316_s25 }
 0x138   : > { %699 = vrot.lane.b32.xlu0 %v532_v48, %s1312_s13 }
 0x13b   : > { %457 = vrot.lane.b32.xlu1 %v581_v56, %s1313_s14 }
 0x13c   : > { %748 = vrot.lane.b32.xlu0 %v581_v56, %s1314_s15 }
 0x13f   : > { %651 = vrot.lane.b32.xlu1 %v484_v57, %s1316_s25 }
 0x140   : > { %797 = vrot.lane.b32.xlu0 %v484_v57, %s1318_s30 }
 0x143   : > { %551 = vrot.lane.b32.xlu1 %v1465_v49, %s1315_s23 }
 0x144   : > { %455 = vrot.lane.b32.xlu0 %v434_v3, %s1313_s14 }
 0x147   : > { %600 = vrot.lane.b32.xlu1 %v434_v3, %s1317_s26 }
 0x148   : > { %504 = vrot.lane.b32.xlu0 %v483_v7, %s1311_s12 }
 0x14b   : > { %649 = vrot.lane.b32.xlu1 %v483_v7, %s1316_s25 }
 0x14c   : > { %697 = vrot.lane.b32.xlu0 %v1465_v49, %s1312_s13 }
 0x14f   : > { %655 = vrot.lane.b32.xlu1 %v632_v10, %s1316_s25 }
 0x150   : > { %746 = vrot.lane.b32.xlu0 %v434_v3, %s1314_s15 }
 0x153   : > { %703 = vrot.lane.b32.xlu1 %v681_v11, %s1312_s13 }
 0x154   : > { %795 = vrot.lane.b32.xlu0 %v483_v7, %s1318_s30 }
 0x157   : > { %752 = vrot.lane.b32.xlu1 %v730_v12, %s1314_s15 }
 0x158   : > { %557 = vrot.lane.b32.xlu0 %v681_v11, %s1315_s23 }
 0x15b   : > { %801 = vrot.lane.b32.xlu1 %v632_v10, %s1318_s30 }
 0x15c   : > { %606 = vrot.lane.b32.xlu0 %v730_v12, %s1317_s26 }
 0x15f   : > { %701 = vrot.lane.b32.xlu1 %v1472_v51, %s1312_s13 }
 0x160   : > { %459 = vrot.lane.b32.xlu0 %v436_v13, %s1313_s14 }
 0x163   : > { %750 = vrot.lane.b32.xlu1 %v436_v13, %s1314_s15 }
 0x164   : > { %508 = vrot.lane.b32.xlu0 %v485_v15, %s1311_s12  ;;  %s215_s12 = sand.u32 1, %s1300_s19  }
 0x167   : > { %799 = vrot.lane.b32.xlu1 %v485_v15, %s1318_s30 }
 0x168   : > { %555 = vrot.lane.b32.xlu0 %v1472_v51, %s1315_s23  ;;  %s1073_s23 = sshll.u32 %s215_s12, 6 }
 0x16b   : > { %803 = vrot.lane.b32.xlu1 %v780_v17, %s1318_s30 }
 0x16c   : > { %604 = vrot.lane.b32.xlu0 %v436_v13, %s1317_s26  ;;  %s1100_s26 = sshll.u32 %s1372_s22, 10  ;;  %s1664_s22 = scalar_lea.sflag [#allocation5], %s215_s12 }
 0x16d   : > { %v499_v18 = vpop.permute.xlu1 %498  ;;  %s1654_s10 = scalar_lea.hbm %s1711_s5, %s1100_s26 }
 0x16e   : > { %v450_v19 = vpop.permute.xlu0 %449 }
 0x16f   : > { %472 = vst.msk [vmem:[#allocation3 + $0x10] sm:$0xff] %vm469_vm3, %v450_v19 }
 0x170   : > { %653 = vrot.lane.b32.xlu0 %v485_v15, %s1316_s25  ;;  %521 = vst.msk [vmem:[#allocation3 + $0x10] sm:$0xff] %vm518_vm4, %v499_v18  ;;  %s217_s25 = scalar_lea.vmem [#allocation4], %s1073_s23 }
 0x171   : > { %v546_v20 = vpop.permute.xlu1 %545 }
 0x172   : > { %v644_v21 = vpop.permute.xlu0 %643 }
 0x174   : > { %791 = vrot.lane.b32.xlu0 %v1496_v58, %s1318_s30  ;;  %s1007_s30 = sshll.u32 %s217_s25, 4  ;;  %s1656_s30 = int_to_ptr.vmem [resolvable:$true] %s1007_s30 }
 0x175   : > { %v595_v22 = vpop.permute.xlu1 %594  ;;  %s1246_s11 = scalar_lea.vmem %s1656_s30, 1024  ;;  %p1253_p0 = scmp.lt.s32.totalorder %s1656_s30, %s1251_s17 }
 0x176   : > { %v692_v23 = vpop.permute.xlu0 %691  ;;  %p1247_p11 = scmp.ne.s32.totalorder %s1656_s30, %s1246_s11  ;;  %p1254_p1 = scmp.lt.s32.totalorder %s1252_s6, %s1246_s11 }
 0x178   : > { %p1248_p12 = pnand %p1247_p11, %p1389_p5  ;;  %p1255_p2 = por %p1254_p1, %p1253_p0 }
 0x179   : > { %v448_v25 = vpop.permute.xlu1 %447 }
 0x17a   : > { %v741_v24 = vpop.permute.xlu0 %740  ;;  %471 = vst.msk [vmem:[#allocation3 + $0x8] sm:$0xff] %vm469_vm3, %v448_v25  ;;  %p1249_p13 = pneg %p1248_p12 }
 0x17c   : > { %p1256_p3 = pnand %p1255_p2, %p1249_p13 }
 0x17d   : > { %v497_v27 = vpop.permute.xlu1 %496 }
 0x17e   : > { %v790_v26 = vpop.permute.xlu0 %789  ;;  %520 = vst.msk [vmem:[#allocation3 + $0x8] sm:$0xff] %vm518_vm4, %v497_v27 }
 0x17f   : > { %569 = vst.msk [vmem:[#allocation3 + $0x8] sm:$0xff] %vm567_vm5, %v546_v20 }
 0x180   : > { %618 = vst.msk [vmem:[#allocation3 + $0x8] sm:$0xff] %vm616_vm6, %v595_v22  ;;  %v1085_v22 = vld [vmem:[%s1710_s4] ss:$0 sm:$0xff] }
 0x181   : > { %v544_v29 = vpop.permute.xlu1 %543  ;;  %667 = vst.msk [vmem:[#allocation3 + $0x8] sm:$0xff] %vm665_vm7, %v644_v21 }
 0x182   : > { %v599_v28 = vpop.permute.xlu0 %598  ;;  %568 = vst.msk [vmem:[#allocation3] sm:$0xff] %vm567_vm5, %v544_v29 }
 0x185   : > { %v593_v31 = vpop.permute.xlu1 %592 }
 0x186   : > { %v648_v30 = vpop.permute.xlu0 %647  ;;  %617 = vst.msk [vmem:[#allocation3] sm:$0xff] %vm616_vm6, %v593_v31 }
 0x189   : > { %v642_v33 = vpop.permute.xlu1 %641 }
 0x18a   : > { %v452_v32 = vpop.permute.xlu0 %451  ;;  %666 = vst.msk [vmem:[#allocation3] sm:$0xff] %vm665_vm7, %v642_v33 }
 0x18b   : > { %473 = vst.msk [vmem:[#allocation3 + $0x18] sm:$0xff] %vm469_vm3, %v452_v32 }
 0x18c   : > { %716 = vst.msk [vmem:[#allocation3] sm:$0xff] %vm715_vm8, %v692_v23 }
 0x18d   : > { %765 = vst.msk [vmem:[#allocation3] sm:$0xff] %vm764_vm9, %v741_v24  ;;  %v550_v35 = vpop.permute.xlu1 %549 }
 0x18e   : > { %814 = vst.msk [vmem:[#allocation3] sm:$0xff] %vm813_vm10, %v790_v26  ;;  %v548_v34 = vpop.permute.xlu0 %547 }
 0x18f   : > { %570 = vst.msk [vmem:[#allocation3 + $0x10] sm:$0xff] %vm567_vm5, %v548_v34 }
 0x191   : > { %v454_v37 = vpop.permute.xlu1 %453 }
 0x192   : > { %v597_v36 = vpop.permute.xlu0 %596  ;;  %474 = vst.msk [vmem:[#allocation3 + $0x20] sm:$0xff] %vm469_vm3, %v454_v37 }
 0x193   : > { %619 = vst.msk [vmem:[#allocation3 + $0x10] sm:$0xff] %vm616_vm6, %v597_v36 }
 0x195   : > { %v822_v38 = vld [vmem:[#allocation3] sm:$0xff]  ;;  %v503_v40 = vpop.permute.xlu1 %502 }
 0x196   : > { %v694_v39 = vpop.permute.xlu0 %693  ;;  %1159 = vmatprep.mubr.msk.f32.mxu0 %vm846_vm11, %v822_v38  ;;  %523 = vst.msk [vmem:[#allocation3 + $0x20] sm:$0xff] %vm518_vm4, %v503_v40 }
 0x197   : > { %717 = vst.msk [vmem:[#allocation3 + $0x8] sm:$0xff] %vm715_vm8, %v694_v39 }
 0x199   : > { %v696_v42 = vpop.permute.xlu1 %695 }
 0x19a   : > { %v743_v41 = vpop.permute.xlu0 %742 }
 0x19b   : > { %766 = vst.msk [vmem:[#allocation3 + $0x8] sm:$0xff] %vm764_vm9, %v743_v41 }
 0x19d   : > { %v745_v44 = vpop.permute.xlu1 %744 }
 0x19e   : > { %v554_v43 = vpop.permute.xlu0 %553 }
 0x1a1   : > { %v794_v46 = vpop.permute.xlu1 %793 }
 0x1a2   : > { %v603_v45 = vpop.permute.xlu0 %602 }
 0x1a5   : > { %v501_v48 = vpop.permute.xlu1 %500 }
 0x1a6   : > { %v507_v47 = vpop.permute.xlu0 %506  ;;  %522 = vst.msk [vmem:[#allocation3 + $0x18] sm:$0xff] %vm518_vm4, %v501_v48 }
 0x1a7   : > { %571 = vst.msk [vmem:[#allocation3 + $0x18] sm:$0xff] %vm567_vm5, %v550_v35 }
 0x1a8   : > { %620 = vst.msk [vmem:[#allocation3 + $0x18] sm:$0xff] %vm616_vm6, %v599_v28 }
 0x1a9   : > { %669 = vst.msk [vmem:[#allocation3 + $0x18] sm:$0xff] %vm665_vm7, %v648_v30  ;;  %v646_v50 = vpop.permute.xlu1 %645 }
 0x1aa   : > { %v700_v49 = vpop.permute.xlu0 %699  ;;  %668 = vst.msk [vmem:[#allocation3 + $0x10] sm:$0xff] %vm665_vm7, %v646_v50 }
 0x1ab   : > { %718 = vst.msk [vmem:[#allocation3 + $0x10] sm:$0xff] %vm715_vm8, %v696_v42 }
 0x1ac   : > { %767 = vst.msk [vmem:[#allocation3 + $0x10] sm:$0xff] %vm764_vm9, %v745_v44 }
 0x1ad   : > { %816 = vst.msk [vmem:[#allocation3 + $0x10] sm:$0xff] %vm813_vm10, %v794_v46  ;;  %v458_v52 = vpop.permute.xlu1 %457 }
 0x1ae   : > { %v749_v51 = vpop.permute.xlu0 %748  ;;  %476 = vst.msk [vmem:[#allocation3 + $0x30] sm:$0xff] %vm469_vm3, %v458_v52 }
 0x1af   : > { %525 = vst.msk [vmem:[#allocation3 + $0x30] sm:$0xff] %vm518_vm4, %v507_v47 }
 0x1b1   : > { %v652_v54 = vpop.permute.xlu1 %651 }
 0x1b2   : > { %v798_v53 = vpop.permute.xlu0 %797 }
 0x1b4   : > { %v824_v55 = vld [vmem:[#allocation3 + $0x10] sm:$0xff] }
 0x1b5   : > { %1162 = vmatprep.mubr.msk.f32.mxu1 %vm846_vm11, %v824_v55  ;;  %v552_v57 = vpop.permute.xlu1 %551 }
 0x1b6   : > { %v456_v56 = vpop.permute.xlu0 %455  ;;  %572 = vst.msk [vmem:[#allocation3 + $0x20] sm:$0xff] %vm567_vm5, %v552_v57 }
 0x1b7   : > { %475 = vst.msk [vmem:[#allocation3 + $0x28] sm:$0xff] %vm469_vm3, %v456_v56 }
 0x1b9   : > { %v601_v59 = vpop.permute.xlu1 %600 }
 0x1ba   : > { %v505_v58 = vpop.permute.xlu0 %504  ;;  %621 = vst.msk [vmem:[#allocation3 + $0x20] sm:$0xff] %vm616_vm6, %v601_v59 }
 0x1bb   : > { %524 = vst.msk [vmem:[#allocation3 + $0x28] sm:$0xff] %vm518_vm4, %v505_v58 }
 0x1bc   : > { %573 = vst.msk [vmem:[#allocation3 + $0x28] sm:$0xff] %vm567_vm5, %v554_v43 }
 0x1bd   : > { %622 = vst.msk [vmem:[#allocation3 + $0x28] sm:$0xff] %vm616_vm6, %v603_v45  ;;  %v650_v61 = vpop.permute.xlu1 %649 }
 0x1be   : > { %671 = vst.msk [vmem:[#allocation3 + $0x28] sm:$0xff] %vm665_vm7, %v652_v54  ;;  %v698_v60 = vpop.permute.xlu0 %697  ;;  %670 = vst.msk [vmem:[#allocation3 + $0x20] sm:$0xff] %vm665_vm7, %v650_v61 }
 0x1bf   : > { %719 = vst.msk [vmem:[#allocation3 + $0x18] sm:$0xff] %vm715_vm8, %v698_v60  ;;  %720 = vst.msk [vmem:[#allocation3 + $0x20] sm:$0xff] %vm715_vm8, %v700_v49 }
 0x1c0   : > { %769 = vst.msk [vmem:[#allocation3 + $0x20] sm:$0xff] %vm764_vm9, %v749_v51 }
 0x1c1   : > { %818 = vst.msk [vmem:[#allocation3 + $0x20] sm:$0xff] %vm813_vm10, %v798_v53  ;;  %v656_v63 = vpop.permute.xlu1 %655 }
 0x1c2   : > { %v747_v62 = vpop.permute.xlu0 %746 }
 0x1c3   : > { %768 = vst.msk [vmem:[#allocation3 + $0x18] sm:$0xff] %vm764_vm9, %v747_v62 }
 0x1c5   : > { %v704_v1 = vpop.permute.xlu1 %703 }
 0x1c6   : > { %v796_v0 = vpop.permute.xlu0 %795 }
 0x1c7   : > { %817 = vst.msk [vmem:[#allocation3 + $0x18] sm:$0xff] %vm813_vm10, %v796_v0 }
 0x1c8   : > { %v826_v7 = vld [vmem:[#allocation3 + $0x20] sm:$0xff] }
 0x1c9   : > { %v753_v3 = vpop.permute.xlu1 %752 }
 0x1ca   : > { %v558_v2 = vpop.permute.xlu0 %557 }
 0x1cd   : > { %v802_v5 = vpop.permute.xlu1 %801 }
 0x1ce   : > { %v607_v4 = vpop.permute.xlu0 %606  ;;  %v825_v6 = vld [vmem:[#allocation3 + $0x18] sm:$0xff] }
 0x1cf   : > { %1163 = vmatmul.mubr.msk.f32.vlgmr.msra.gmra.mrb[0].mxu1 %vm846_vm11, %v825_v6 }
 0x1d0   : > { %1165 = vmatprep.mubr.msk.f32.mxu1 %vm846_vm11, %v826_v7 }
 0x1d1   : > { %v702_v9 = vpop.permute.xlu1 %701 }
 0x1d2   : > { %v460_v8 = vpop.permute.xlu0 %459  ;;  %721 = vst.msk [vmem:[#allocation3 + $0x28] sm:$0xff] %vm715_vm8, %v702_v9 }
 0x1d3   : > { %477 = vst.msk [vmem:[#allocation3 + $0x38] sm:$0xff] %vm469_vm3, %v460_v8 }
 0x1d5   : > { %v751_v11 = vpop.permute.xlu1 %750 }
 0x1d6   : > { %v509_v10 = vpop.permute.xlu0 %508  ;;  %770 = vst.msk [vmem:[#allocation3 + $0x28] sm:$0xff] %vm764_vm9, %v751_v11 }
 0x1d7   : > { %526 = vst.msk [vmem:[#allocation3 + $0x38] sm:$0xff] %vm518_vm4, %v509_v10 }
 0x1d8   : > { %575 = vst.msk [vmem:[#allocation3 + $0x38] sm:$0xff] %vm567_vm5, %v558_v2 }
 0x1d9   : > { %624 = vst.msk [vmem:[#allocation3 + $0x38] sm:$0xff] %vm616_vm6, %v607_v4  ;;  %v800_v13 = vpop.permute.xlu1 %799 }
 0x1da   : > { %673 = vst.msk [vmem:[#allocation3 + $0x38] sm:$0xff] %vm665_vm7, %v656_v63  ;;  %v556_v12 = vpop.permute.xlu0 %555 }
 0x1db   : > { %723 = vst.msk [vmem:[#allocation3 + $0x38] sm:$0xff] %vm715_vm8, %v1554_v14 }
 0x1dc   : > { %574 = vst.msk [vmem:[#allocation3 + $0x30] sm:$0xff] %vm567_vm5, %v556_v12 }
 0x1dd   : > { %819 = vst.msk [vmem:[#allocation3 + $0x28] sm:$0xff] %vm813_vm10, %v800_v13  ;;  %v804_v17 = vpop.permute.xlu1 %803 }
 0x1de   : > { %772 = vst.msk [vmem:[#allocation3 + $0x38] sm:$0xff] %vm764_vm9, %v1561_v16  ;;  %v605_v15 = vpop.permute.xlu0 %604 }
 0x1df   : > { %623 = vst.msk [vmem:[#allocation3 + $0x30] sm:$0xff] %vm616_vm6, %v605_v15 }
 0x1e0   : > { %821 = vst.msk [vmem:[#allocation3 + $0x38] sm:$0xff] %vm813_vm10, %v804_v17 }
 0x1e2   : > { %v654_v18 = vpop.permute.xlu0 %653 }
 0x1e3   : > { %672 = vst.msk [vmem:[#allocation3 + $0x30] sm:$0xff] %vm665_vm7, %v654_v18 }
 0x1e4   : > { %v827_v19 = vld [vmem:[#allocation3 + $0x28] sm:$0xff]  ;;  %722 = vst.msk [vmem:[#allocation3 + $0x30] sm:$0xff] %vm715_vm8, %v704_v1 }
 0x1e5   : > { %1166 = vmatmul.mubr.msk.f32.gmra.mrb[2].mxu1 %vm846_vm11, %v827_v19  ;;  %771 = vst.msk [vmem:[#allocation3 + $0x30] sm:$0xff] %vm764_vm9, %v753_v3 }
 0x1e6   : > { %820 = vst.msk [vmem:[#allocation3 + $0x30] sm:$0xff] %vm813_vm10, %v802_v5  ;;  %v792_v14 = vpop.permute.xlu0 %791 }
 0x1e7   : > { %815 = vst.msk [vmem:[#allocation3 + $0x8] sm:$0xff] %vm813_vm10, %v792_v14  ;;  %v829_v16 = vld [vmem:[#allocation3 + $0x38] sm:$0xff] }
 0x1ed   : > { %v828_v20 = vld [vmem:[#allocation3 + $0x30] sm:$0xff] }
 0x1ee   : > { %1168 = vmatprep.mubr.msk.f32.mxu1 %vm846_vm11, %v828_v20  ;;  %v823_v21 = vld [vmem:[#allocation3 + $0x8] sm:$0xff] }
 0x1ef   : > { %1160 = vmatmul.mubr.msk.f32.vlgmr.msra.gmra.mrb[8].mxu0 %vm846_vm11, %v823_v21  ;;  %1169 = vmatmul.mubr.msk.f32.gmra.mrb[4].mxu1 %vm846_vm11, %v829_v16 }
 0x2a2   : > { %v1164_v23 = vpop.f32.mrb[0].mxu1 }
 0x2a3   : > { %v953_v24 = vadd.f32 %v1164_v23, %v1085_v22  ;;  %v947_v25 = vpop.f32.mrb[1].mxu1 }
 0x2a4   : > { %v948_v26 = vadd.f32 %v1085_v22, %v947_v25 }
 0x2a5   : > { %v979_v27 = vmax.f32 %v953_v24, 0.0 }
 0x2a6   : > { %v978_v28 = vmax.f32 %v948_v26, 0.0 }
 0x2a7   : > { %988 = vst.msk [vmem:[%s217_s25 + $0x18] sm:$0xff] %vm984_vm12, %v979_v27 }
 0x2a8   : > { %987 = vst.msk [vmem:[%s217_s25 + $0x10] sm:$0xff] %vm984_vm12, %v978_v28 }
 0x2b8   : > { %v1167_v29 = vpop.f32.mrb[2].mxu1 }
 0x2b9   : > { %v963_v30 = vadd.f32 %v1167_v29, %v1085_v22  ;;  %v957_v31 = vpop.f32.mrb[3].mxu1 }
 0x2ba   : > { %v958_v32 = vadd.f32 %v1085_v22, %v957_v31 }
 0x2bb   : > { %v981_v33 = vmax.f32 %v963_v30, 0.0 }
 0x2bc   : > { %v980_v34 = vmax.f32 %v958_v32, 0.0 }
 0x2bd   : > { %990 = vst.msk [vmem:[%s217_s25 + $0x28] sm:$0xff] %vm984_vm12, %v981_v33 }
 0x2be   : > { %989 = vst.msk [vmem:[%s217_s25 + $0x20] sm:$0xff] %vm984_vm12, %v980_v34 }
 0x2c2   : > { %v1161_v35 = vpop.f32.mrb[8].mxu0  ;;  %v1170_v36 = vpop.f32.mrb[4].mxu1 }
 0x2c3   : > { %v943_v37 = vadd.f32 %v1161_v35, %v1085_v22  ;;  %v973_v38 = vadd.f32 %v1170_v36, %v1085_v22  ;;  %v937_v39 = vpop.f32.mrb[9].mxu0  ;;  %v967_v40 = vpop.f32.mrb[5].mxu1 }
 0x2c4   : > { %v938_v41 = vadd.f32 %v1085_v22, %v937_v39  ;;  %v968_v42 = vadd.f32 %v1085_v22, %v967_v40 }
 0x2c5   : > { %v977_v43 = vmax.f32 %v943_v37, 0.0  ;;  %v983_v44 = vmax.f32 %v973_v38, 0.0 }
 0x2c6   : > { %v976_v45 = vmax.f32 %v938_v41, 0.0  ;;  %v982_v46 = vmax.f32 %v968_v42, 0.0 }
 0x2c7   : > { %986 = vst.msk [vmem:[%s217_s25 + $0x8] sm:$0xff] %vm984_vm12, %v977_v43  ;;  %992 = vst.msk [vmem:[%s217_s25 + $0x38] sm:$0xff] %vm984_vm12, %v983_v44 }
 0x2c8   : > { %985 = vst.msk [vmem:[%s217_s25] sm:$0xff] %vm984_vm12, %v976_v45  ;;  %991 = vst.msk [vmem:[%s217_s25 + $0x30] sm:$0xff] %vm984_vm12, %v982_v46 }
 0x2c9   : > { %1259 = shalt.err (!%p1256_p3)
}
 0x2ca   : > { %s1260_s7 = scalar_lea.hbm %s1654_s10, 1024  ;;  %s1264_s15 = scalar_lea.hbm %s1711_s5, 2048 }
 0x2cb   : > { %p1261_p4 = scmp.ne.s32.totalorder %s1654_s10, %s1260_s7  ;;  %p1265_p9 = scmp.lt.u32.totalorder %s1654_s10, %s1711_s5 }
 0x2cc   : > { %p1266_p10 = scmp.lt.u32.totalorder %s1264_s15, %s1260_s7  ;;  %p1268_p12 = scmp.lt.u32.totalorder %s1260_s7, %s1654_s10 }
 0x2cd   : > { %p1262_p7 = pnand %p1261_p4, %p1389_p5 }
 0x2ce   : > { %p1267_p11 = por %p1266_p10, %p1265_p9 }
 0x2cf   : > { %p1263_p8 = pneg %p1262_p7 }
 0x2d0   : > { %p1269_p13 = por %p1268_p12, %p1267_p11 }
 0x2d2   : > { %p1270_p0 = pnand %p1269_p13, %p1263_p8 }
 0x2d4   : > { %1273 = shalt.err (!%p1270_p0)
}
 0x2d5   : > { %s1320_s26 = smov 128  }
 0x2d6   : > { %1197 = dma.vmem_to_hbm [thread:$0]  (%p1389_p5), %s1656_s30, 1024, %s1654_s10, %s1664_s22, %s1320_s26, %s1320_s26, %s1313_s14  }
 0x2d7 PF: > { %p1203_p1 = scmp.ge.s32.totalorder %s1308_s21, 2  ;;  %s1022_s8 = sand.u32 1, %s1296_s18  }
 0x2d8   : > { %s1023_s9 = scalar_lea.sflag [#allocation5], %s1022_s8 }
 0x2d9   : > { %p1200_p2 = pnand %p1203_p1, %p1393_p6 }
 0x2db   : > { %1291 = dma.done.wait (!%p1200_p2), %s1023_s9, 1024  }
 0x2dc   : > { %1293 = vsyncadd (!%p1200_p2), %s1023_s9, 4294966272  ;;  %p15_p3 = scmp.ge.s32.totalorder %s1376_s24, 4   ;;  %s1714_s18 = smov %s1300_s19 }
 0x2dd   : > { %s1715_s19 = smov %s1304_s20  ;;  %s1716_s20 = smov %s1387_s27 }
 0x2de   : > { %s1717_s21 = smov %s1376_s24  ;;  %17 = sbr.rel (!%p15_p3) target bundleno = 3 (0x3), region = 78 }
 0x2e5   :  { %1028 = vsyncpa [#allocation5], 1 }
 0x2e6   :  { %1030 = vsyncpa [#allocation5 + $0x1], 1 }

</bundles_post_ra>
